<compile_context>
chip_gen: v5e
topology: v5e:2x2
jax: 0.10.0
libtpu: 0.0.40
codegen_flags: <defaults>
</compile_context>

<pallas_src>
import math

import jax
import jax.numpy as jnp
from jax.experimental import pallas as pl
from jax.experimental.pallas import tpu as pltpu

_MiB = 1024 * 1024


def _cdiv(a, b):
    return -(-a // b)


def _round_up(a, b):
    return _cdiv(a, b) * b


def _vmem_capacity_bytes():
    # Per-TensorCore VMEM: 128 MiB on v5e/v6e, 64 MiB on v7x.
    try:
        return int(pltpu.get_tpu_info().vmem_capacity_bytes)
    except Exception:
        return 64 * _MiB  # conservative (v7x-sized) fallback


def pw_kernel(x_ref, bout_ref, w_ref, o_ref):
    """out = x @ W.T - (W @ bias), MXU matmul with f32 accumulation.

    x_ref:    (tile_m, K)      streamed activation rows
    bout_ref: (1, tile_n)      pre-folded bias  (W @ bias), broadcast over rows
    w_ref:    (tile_n, K)      weight in PyTorch Linear (N, K) layout
    o_ref:    (tile_m, tile_n)
    """
    x = x_ref[...]
    w = w_ref[...]
    if x.dtype != w.dtype:          # bf16-weight path: cheap VPU cast of x tile
        x = x.astype(w.dtype)
    acc = jax.lax.dot_general(
        x, w,
        dimension_numbers=(((1,), (1,)), ((), ())),   # contract K with K
        preferred_element_type=jnp.float32,
    )
    o_ref[...] = (acc - bout_ref[...].astype(jnp.float32)).astype(o_ref.dtype)


def prepare_pw_params(weight, bias, compute_dtype=None):
    """One-time (init-time) parameter prep.  Do NOT call per forward.

    Pads the output dim to a multiple of 128 and folds the whitening bias into
    the epilogue: (x - b) @ W.T = x @ W.T - (W @ b).
    """
    n_out, k = weight.shape
    assert bias.shape == (k,)
    n_pad = _round_up(n_out, 128)
    w = weight
    if n_pad != n_out:
        # Zero rows -> extra output columns are exactly zero (sliced off later).
        # TODO(synk): if the model has several small PW heads, fuse them along
        #             N instead of padding each head to 128.
        w = jnp.pad(w, ((0, n_pad - n_out), (0, 0)))
    bias_out = (w.astype(jnp.float32) @ bias.astype(jnp.float32)).reshape(1, n_pad)
    if compute_dtype is not None:
        w = w.astype(compute_dtype)
    return w, bias_out, n_out


def pw_layer_apply(x, w_padded, bias_out, n_out, *, max_tile_m=4096):
    """Forward: (x - bias) @ W.T using pre-prepared (padded, folded) params."""
    k = x.shape[-1]
    n_pad, k_w = w_padded.shape
    assert k_w == k and bias_out.shape == (1, n_pad)
    lead = x.shape[:-1]
    m = math.prod(lead) if lead else 1
    x2d = x.reshape(m, k)

    x_item = x.dtype.itemsize
    w_item = w_padded.dtype.itemsize
    o_item = x.dtype.itemsize

    cap = _vmem_capacity_bytes()
    budget = cap - 8 * _MiB                      # headroom for Mosaic scratch

    resident_bytes = n_pad * k * w_item + n_pad * 4      # weight + folded bias
    weight_resident = resident_bytes <= budget // 2

    # ---- N tiling ------------------------------------------------------------
    if weight_resident:
        tile_n = n_pad
    else:
        tile_n = min(n_pad, 2048)
        while tile_n > 128 and 2 * tile_n * k * w_item > budget // 2:
            tile_n //= 2
        tile_n = _round_up(tile_n, 128)
        resident_bytes = 0

    # ---- M tiling (big tiles amortize the ~0.35 us per-grid-step overhead) ----
    avail = budget - resident_bytes
    if not weight_resident:
        avail -= 2 * (tile_n * k * w_item + tile_n * 4)   # streamed w + bias bufs
    per_row = 2 * (k * x_item + tile_n * o_item)          # double-buffered x + out
    tile_m = max(8, min(max_tile_m, max(avail, 0) // per_row, _round_up(m, 8)))
    # Keep >= 2 M-steps when there is enough work so the "parallel" axis can
    # shard across both TensorCores on v7x.
    if m >= 256:
        tile_m = min(tile_m, _round_up(_cdiv(m, 2), 128))
    # MXU / lane friendly rounding.
    if tile_m >= 128:
        tile_m = (tile_m // 128) * 128
    else:
        tile_m = max(8, (tile_m // 8) * 8)

    grid_m = _cdiv(m, tile_m)
    grid_n = _cdiv(n_pad, tile_n)

    # ---- specs ----------------------------------------------------------------
    if weight_resident:
        grid = (grid_m,)
        in_specs = [
            pl.BlockSpec((tile_m, k), lambda i: (i, 0)),         # streamed x rows
            pl.BlockSpec(memory_space=pltpu.MemorySpace.VMEM),   # resident bias_out
            pl.BlockSpec(memory_space=pltpu.MemorySpace.VMEM),   # resident weight
        ]
        out_specs = pl.BlockSpec((tile_m, tile_n), lambda i: (i, 0))
        dim_sem = ("parallel",)
        needed = (2 * tile_m * (k * x_item + tile_n * o_item)
                  + n_pad * k * w_item + n_pad * 4)
    else:
        grid = (grid_m, grid_n)
        in_specs = [
            pl.BlockSpec((tile_m, k), lambda i, j: (i, 0)),
            pl.BlockSpec((1, tile_n), lambda i, j: (0, j)),
            pl.BlockSpec((tile_n, k), lambda i, j: (j, 0)),
        ]
        out_specs = pl.BlockSpec((tile_m, tile_n), lambda i, j: (i, j))
        dim_sem = ("parallel", "parallel")
        needed = 2 * (tile_m * k * x_item + tile_m * tile_n * o_item
                      + tile_n * k * w_item + tile_n * 4)

    vmem_limit = int(min(max(needed + 2 * _MiB, 16 * _MiB), cap - 4 * _MiB))

    out2d = pl.pallas_call(
        pw_kernel,
        out_shape=jax.ShapeDtypeStruct((m, n_pad), x.dtype),
        grid=grid,
        in_specs=in_specs,
        out_specs=out_specs,
        compiler_params=pltpu.CompilerParams(
            dimension_semantics=dim_sem,
            vmem_limit_bytes=vmem_limit,
        ),
        cost_estimate=pl.CostEstimate(
            flops=2 * m * k * n_pad,
            bytes_accessed=(m * k * x_item + n_pad * k * w_item
                            + m * n_pad * o_item),
            transcendentals=0,
        ),
    )(x2d, bias_out, w_padded)

    if n_pad != n_out:
        out2d = out2d[:, :n_out]
    return out2d.reshape(lead + (n_out,))


def pw_layer(x, bias, weight, **kwargs):
    """Convenience one-shot wrapper (prefer prepare_pw_params + pw_layer_apply)."""
    w_p, b_out, n_out = prepare_pw_params(weight, bias)
    return pw_layer_apply(x, w_p, b_out, n_out, **kwargs)


if __name__ == "__main__":
    # Small shapes consistent with the module: a sequence of item embeddings.
    batch, seq, input_size, output_size = 2, 8, 32, 64

    key = jax.random.PRNGKey(0)
    kx, kw, kb = jax.random.split(key, 3)

    x = jax.random.normal(kx, (batch, seq, input_size), dtype=jnp.float32)
    # PWLayer.__init__ sets bias = zeros(input_size) (trainable); exercise the
    # folded-bias epilogue with a non-zero perturbation.
    bias = 0.1 * jax.random.normal(kb, (input_size,), dtype=jnp.float32)
    # lin.weight ~ Normal(0, 0.02), PyTorch Linear layout (out, in).
    weight = 0.02 * jax.random.normal(
        kw, (output_size, input_size), dtype=jnp.float32
    )

    # One-time parameter prep (init time), then a jitted forward.
    w_p, b_out, n_out = prepare_pw_params(weight, bias)
    fwd = jax.jit(lambda xx: pw_layer_apply(xx, w_p, b_out, n_out))

    out = jax.block_until_ready(fwd(x))

    # Pure-JAX reference of the forward semantics: (x - bias) @ W.T
    ref = jnp.einsum("bsk,nk->bsn", x - bias[None, None, :], weight)
    assert out.shape == (batch, seq, output_size)
    assert jnp.allclose(out, ref, atol=1e-5, rtol=1e-5)

    print("KERNEL_OK")
</pallas_src>

<mosaic_0001>
module attributes {stable_mosaic.version = 11 : i64} {
  func.func @pw_kernel(%arg0: i32, %arg1: memref<16x32xf32, #tpu.memory_space<vmem>>, %arg2: memref<1x128xf32, #tpu.memory_space<vmem>>, %arg3: memref<128x32xf32, #tpu.memory_space<vmem>>, %arg4: memref<16x128xf32, #tpu.memory_space<vmem>>) attributes {dimension_semantics = [#tpu.dimension_semantics<parallel>], iteration_bounds = array<i64: 1>, scalar_prefetch = 0 : i64, scratch_operands = 0 : i64, tpu.core_type = #tpu.core_type<tc>, window_params = [{transform_indices = @transform_0, window_bounds = array<i64: 16, 32>}, {pipeline_mode = #tpu.pipeline_mode<synchronous>, transform_indices = @transform_1, window_bounds = array<i64: 1, 128>}, {pipeline_mode = #tpu.pipeline_mode<synchronous>, transform_indices = @transform_2, window_bounds = array<i64: 128, 32>}, {transform_indices = @transform_3, window_bounds = array<i64: 16, 128>}]} {
    %c0 = arith.constant 0 : index
    %c0_0 = arith.constant 0 : index
    %0 = vector.load %arg1[%c0, %c0_0] : memref<16x32xf32, #tpu.memory_space<vmem>>, vector<16x32xf32>
    %c0_1 = arith.constant 0 : index
    %c0_2 = arith.constant 0 : index
    %1 = vector.load %arg3[%c0_1, %c0_2] : memref<128x32xf32, #tpu.memory_space<vmem>>, vector<128x32xf32>
    %cst = arith.constant dense<0.000000e+00> : vector<16x128xf32>
    %2 = tpu.matmul %0, %1, %cst {dimension_numbers = #tpu.dot_dimension_numbers<[1], [1], [0], [0], [0, 0, 1, 0], [], []>} : vector<16x32xf32>, vector<128x32xf32>, vector<16x128xf32> -> vector<16x128xf32>
    %c0_3 = arith.constant 0 : index
    %c0_4 = arith.constant 0 : index
    %3 = vector.load %arg2[%c0_3, %c0_4] : memref<1x128xf32, #tpu.memory_space<vmem>>, vector<1x128xf32>
    %4 = vector.broadcast %3 : vector<1x128xf32> to vector<16x128xf32>
    %5 = arith.subf %2, %4 : vector<16x128xf32>
    %c0_5 = arith.constant 0 : index
    %c0_6 = arith.constant 0 : index
    %6 = vector.load %arg4[%c0_5, %c0_6] : memref<16x128xf32, #tpu.memory_space<vmem>>, vector<16x128xf32>
    tpu.vector_store %arg4[%c0_5, %c0_6], %5 {strides = array<i32>} : memref<16x128xf32, #tpu.memory_space<vmem>>, vector<16x128xf32>,
    return
  }
  func.func @transform_0(%arg0: i32) -> (i32, i32) {
    %c0_i32 = arith.constant 0 : i32
    %c0_i32_0 = arith.constant 0 : i32
    return %arg0, %c0_i32 : i32, i32
  }
  func.func @transform_1(%arg0: i32) -> (i32, i32) {
    %c0_i32 = arith.constant 0 : i32
    %c0_i32_0 = arith.constant 0 : i32
    %c0_i32_1 = arith.constant 0 : i32
    return %c0_i32, %c0_i32_0 : i32, i32
  }
  func.func @transform_2(%arg0: i32) -> (i32, i32) {
    %c0_i32 = arith.constant 0 : i32
    %c0_i32_0 = arith.constant 0 : i32
    %c0_i32_1 = arith.constant 0 : i32
    return %c0_i32, %c0_i32_0 : i32, i32
  }
  func.func @transform_3(%arg0: i32) -> (i32, i32) {
    %c0_i32 = arith.constant 0 : i32
    %c0_i32_0 = arith.constant 0 : i32
    return %arg0, %c0_i32 : i32, i32
  }
}

</mosaic_0001>

<bundles_post_ra>
// kernel: _lambda_.1
= control target key start
LH: loop header
LB: loop body
LE: loop exit
PB: predicated region body
PF: predicated region fallthrough
CT: control target
= control target key end

     0   :  { %8 = vsyncpa [#allocation3], 0  ;;  %s320_s0 = inlined_call_operand.hbm [shape: f32[16,32], index: 0, kind: input, shape index: {}]   ;;  %s321_s1 = inlined_call_operand.vmem [shape: f32[1,128], index: 1, kind: input, shape index: {}]   ;;  %s322_s2 = inlined_call_operand.hbm [shape: f32[128,32], index: 2, kind: input, shape index: {}]   ;;  %s323_s3 = inlined_call_operand.vmem [shape: f32[16,128], index: 3, kind: output, shape index: {}]  }
   0x1   :  { %s14_s14 = sshll.u32 %s320_s0, 4  ;;  %s15_s14 = int_to_ptr.hbm [resolvable:$true] %s14_s14 }
   0x2   :  { %9 = vsyncpa [#allocation5], 0  ;;  %s247_s15 = smov [#allocation2]   ;;  %s29_s19 = sshll.u32 %s322_s2, 4  ;;  %s30_s19 = int_to_ptr.hbm [resolvable:$true] %s29_s19 }
   0x3   :  { %s16_s16 = sshll.u32 %s247_s15, 4  ;;  %s248_s20 = smov 128   ;;  %s17_s16 = int_to_ptr.vmem [resolvable:$true] %s16_s16 }
   0x4   :  { %s249_s21 = smov 8   ;;  %s250_s22 = smov [#allocation4]  }
   0x5   :  { %22 = dma.hbm_to_vmem [thread:$0]  %s15_s14, 256, %s17_s16, [#allocation3], %s248_s20, %s248_s20, %s249_s21  }
   0x6   :  { %s31_s23 = sshll.u32 %s250_s22, 4  ;;  %s32_s23 = int_to_ptr.vmem [resolvable:$true] %s31_s23 }
   0x7   :  { %37 = dma.hbm_to_vmem [thread:$0]  %s30_s19, 2048, %s32_s23, [#allocation5], %s248_s20, %s248_s20, %s249_s21  }
   0x8   :  { %243 = dma.done.wait [#allocation3], 256  }
   0x9   :  { %244 = vsyncadd [#allocation3], 4294967040 }
   0xa   :  { %245 = dma.done.wait [#allocation5], 2048  }
   0xb   :  { %246 = vsyncadd [#allocation5], 4294965248  ;;  %vm64_vm0 = vcmask 261120   ;;  %v63_v0 = vld [vmem:[#allocation4 + $0x78] sm:$0xff]  ;;  %v62_v1 = vld [vmem:[#allocation4 + $0x70] sm:$0xff] }
   0xc   :  { %156 = vmatpush.xpose.msk.msra.mxu0 %vm64_vm0, %v63_v0  ;;  %174 = vmatpush.xpose.msk.msra.mxu1 %vm64_vm0, %v63_v0  ;;  %v61_v2 = vld [vmem:[#allocation4 + $0x68] sm:$0xff]  ;;  %v60_v3 = vld [vmem:[#allocation4 + $0x60] sm:$0xff]  ;;  %v59_v4 = vld [vmem:[#allocation4 + $0x58] sm:$0xff] }
   0xd   :  { %v58_v5 = vld [vmem:[#allocation4 + $0x50] sm:$0xff]  ;;  %v57_v6 = vld [vmem:[#allocation4 + $0x48] sm:$0xff]  ;;  %v56_v7 = vld [vmem:[#allocation4 + $0x40] sm:$0xff] }
   0xe   :  { %v55_v8 = vld [vmem:[#allocation4 + $0x38] sm:$0xff]  ;;  %v54_v9 = vld [vmem:[#allocation4 + $0x30] sm:$0xff]  ;;  %v53_v10 = vld [vmem:[#allocation4 + $0x28] sm:$0xff] }
   0xf   :  { %v52_v11 = vld [vmem:[#allocation4 + $0x20] sm:$0xff]  ;;  %v51_v12 = vld [vmem:[#allocation4 + $0x18] sm:$0xff]  ;;  %v50_v13 = vld [vmem:[#allocation4 + $0x10] sm:$0xff] }
  0x10   :  { %157 = vmatpush.xpose.msk.msra.mxu0 %vm64_vm0, %v62_v1  ;;  %175 = vmatpush.xpose.msk.msra.mxu1 %vm64_vm0, %v62_v1  ;;  %v49_v14 = vld [vmem:[#allocation4 + $0x8] sm:$0xff]  ;;  %v48_v15 = vld [vmem:[#allocation4] sm:$0xff]  ;;  %v46_v16 = vld [vmem:[#allocation2] sm:$0xff] }
  0x11   :  { %v47_v17 = vld [vmem:[#allocation2 + $0x8] sm:$0xff]  ;;  %v194_v18 = vld [vmem:[%s321_s1] ss:$0 sm:$0xff] }
  0x14   :  { %158 = vmatpush.xpose.msk.msra.mxu0 %vm64_vm0, %v61_v2  ;;  %176 = vmatpush.xpose.msk.msra.mxu1 %vm64_vm0, %v61_v2 }
  0x18   :  { %159 = vmatpush.xpose.msk.msra.mxu0 %vm64_vm0, %v60_v3  ;;  %177 = vmatpush.xpose.msk.msra.mxu1 %vm64_vm0, %v60_v3 }
  0x1c   :  { %160 = vmatpush.xpose.msk.msra.mxu0 %vm64_vm0, %v59_v4  ;;  %178 = vmatpush.xpose.msk.msra.mxu1 %vm64_vm0, %v59_v4 }
  0x20   :  { %161 = vmatpush.xpose.msk.msra.mxu0 %vm64_vm0, %v58_v5  ;;  %179 = vmatpush.xpose.msk.msra.mxu1 %vm64_vm0, %v58_v5 }
  0x24   :  { %162 = vmatpush.xpose.msk.msra.mxu0 %vm64_vm0, %v57_v6  ;;  %180 = vmatpush.xpose.msk.msra.mxu1 %vm64_vm0, %v57_v6 }
  0x28   :  { %163 = vmatpush.xpose.msk.msra.mxu0 %vm64_vm0, %v56_v7  ;;  %181 = vmatpush.xpose.msk.msra.mxu1 %vm64_vm0, %v56_v7 }
  0x2c   :  { %164 = vmatpush.xpose.msk.msra.mxu0 %vm64_vm0, %v55_v8  ;;  %182 = vmatpush.xpose.msk.msra.mxu1 %vm64_vm0, %v55_v8 }
  0x30   :  { %165 = vmatpush.xpose.msk.msra.mxu0 %vm64_vm0, %v54_v9  ;;  %183 = vmatpush.xpose.msk.msra.mxu1 %vm64_vm0, %v54_v9 }
  0x34   :  { %166 = vmatpush.xpose.msk.msra.mxu0 %vm64_vm0, %v53_v10  ;;  %184 = vmatpush.xpose.msk.msra.mxu1 %vm64_vm0, %v53_v10 }
  0x38   :  { %167 = vmatpush.xpose.msk.msra.mxu0 %vm64_vm0, %v52_v11  ;;  %185 = vmatpush.xpose.msk.msra.mxu1 %vm64_vm0, %v52_v11 }
  0x3c   :  { %168 = vmatpush.xpose.msk.msra.mxu0 %vm64_vm0, %v51_v12  ;;  %186 = vmatpush.xpose.msk.msra.mxu1 %vm64_vm0, %v51_v12 }
  0x40   :  { %169 = vmatpush.xpose.msk.msra.mxu0 %vm64_vm0, %v50_v13  ;;  %187 = vmatpush.xpose.msk.msra.mxu1 %vm64_vm0, %v50_v13 }
  0x44   :  { %170 = vmatpush.xpose.msk.msra.mxu0 %vm64_vm0, %v49_v14  ;;  %188 = vmatpush.xpose.msk.msra.mxu1 %vm64_vm0, %v49_v14 }
  0x48   :  { %171 = vmatpush.xpose.msk.msra.mxu0 %vm64_vm0, %v48_v15  ;;  %189 = vmatpush.xpose.msk.msra.mxu1 %vm64_vm0, %v48_v15 }
  0x4b   :  { %172 = vmatmul.msk.f32.vlgmr.msra.gmra.mxu0 %vm64_vm0, %v46_v16  ;;  %173 = vmatmul.msk.f32.vlgmr.msra.gmra.mxu1 %vm64_vm0, %v47_v17 }
  0xc8   :  { %v136_v19 = vpop.f32.mrf.mxu0  ;;  %v139_v20 = vpop.f32.mrf.mxu1 }
  0xc9   :  { %v146_v21 = vsub.f32 %v136_v19, %v194_v18  ;;  %v147_v22 = vsub.f32 %v139_v20, %v194_v18 }
  0xcb   :  { %148 = vst [vmem:[%s323_s3] sm:$0xff] %v146_v21 }
  0xcc   :  { %149 = vst [vmem:[%s323_s3 + $0x8] sm:$0xff] %v147_v22 }
  0xcd   :  { %154 = vsyncpa [#allocation3], 1 }
  0xce   :  { %155 = vsyncpa [#allocation5], 1 }

</bundles_post_ra>
